<compile_context>
chip_gen: v6e
topology: v6e:2x2x1
jax: 0.10.0
libtpu: 0.0.40
codegen_flags: <defaults>
</compile_context>

<pallas_src>
import functools

import jax
import jax.numpy as jnp
from jax import lax
from jax.experimental import pallas as pl
from jax.experimental.pallas import tpu as pltpu

_LANES = 128
_CHUNK = 1024  # lanes processed per inner (statically unrolled) step


def _tree_add(parts):
    """Pairwise-tree sum of equal-shaped arrays (breaks serial add chains)."""
    parts = list(parts)
    while len(parts) > 1:
        nxt = [parts[k] + parts[k + 1] for k in range(0, len(parts) - 1, 2)]
        if len(parts) % 2:
            nxt.append(parts[-1])
        parts = nxt
    return parts[0]


def _fold_lanes(x):
    """(C, W) -> (C, 128) by tree-adding 128-lane-aligned slices (pure VPU)."""
    w = x.shape[-1]
    return _tree_add([x[:, j * _LANES:(j + 1) * _LANES] for j in range(w // _LANES)])


def _dice_sums_kernel(logits_ref, labels_ref, inter_ref, pcnt_ref, *,
                      hw_total, tp, tiles_per_p, mask_needed):
    @pl.when(pl.program_id(2) == 0)
    def _():
        inter_ref[...] = jnp.zeros_like(inter_ref)
        pcnt_ref[...] = jnp.zeros_like(pcnt_ref)

    logits = logits_ref[0]   # (C, tp), native float dtype (bf16 stays bf16)
    labels = labels_ref[0]   # (1, tp) int32
    n_cls = logits.shape[0]

    if mask_needed:
        # Global pixel-tile index (unclamped) -> base pixel offset of this tile.
        g = pl.program_id(1) * tiles_per_p + pl.program_id(2)
        base = g * tp

    cls_iota_cache = {}
    col_iota_cache = {}
    inter_parts = []
    pcnt_parts = []

    for off in range(0, tp, _CHUNK):
        w = min(_CHUNK, tp - off)
        lg = logits[:, off:off + w]     # (C, w)
        lb = labels[:, off:off + w]     # (1, w)

        if w not in cls_iota_cache:
            cls_iota_cache[w] = lax.broadcasted_iota(jnp.int32, (n_cls, w), 0)
        cls_iota = cls_iota_cache[w]

        # argmax over the class axis, first-occurrence tie-break (== jnp.argmax).
        mx = jnp.max(lg, axis=0, keepdims=True)                       # (1, w)
        pred = jnp.min(jnp.where(lg == mx, cls_iota, n_cls),
                       axis=0, keepdims=True)                         # (1, w)

        if mask_needed:
            # Neutralize lanes past the true pixel count (partial / ghost tiles)
            # with a single (1, w) select: out-of-range class contributes 0.
            if w not in col_iota_cache:
                col_iota_cache[w] = lax.broadcasted_iota(jnp.int32, (1, w), 1)
            valid = (base + off + col_iota_cache[w]) < hw_total
            pred = jnp.where(valid, pred, n_cls)

        pred_oh = cls_iota == pred                                    # (C, w) bool
        match = pred == lb                                            # (1, w) bool
        inter_oh = jnp.logical_and(pred_oh, match)                    # (C, w) bool

        inter_parts.append(_fold_lanes(inter_oh.astype(jnp.int32)))
        pcnt_parts.append(_fold_lanes(pred_oh.astype(jnp.int32)))

    inter_ref[0, 0] += _tree_add(inter_parts)
    pcnt_ref[0, 0] += _tree_add(pcnt_parts)


@functools.partial(
    jax.jit, static_argnames=("n_classes", "skip_first_class", "smooth", "tp"))
def dice_score(inputs, truth, *, n_classes, skip_first_class=True,
               smooth=1e-7, tp=8192):
    """inputs: (N, C, H, W) float logits; truth: (N, H, W) int labels -> scalar dice."""
    n, c, h, w = inputs.shape
    assert c == n_classes
    hw = h * w

    # Contiguous reshapes only -- no transpose / padding copies in HBM.
    logits = inputs.reshape(n, c, hw)
    labels = truth.reshape(n, 1, hw).astype(jnp.int32)

    # Pixel tile: as large as allowed (amortizes the ~0.35us/step pipeline
    # overhead), clipped to the 128-rounded pixel count and to a conservative
    # VMEM budget for the double-buffered input streams (keeps large class
    # counts inside v7x's 64 MiB physical VMEM as well).
    in_bytes = jnp.dtype(inputs.dtype).itemsize
    vmem_budget = 20 * 1024 * 1024
    per_lane_bytes = 2 * (c * in_bytes + 4)
    tp_cap = max(_LANES, (vmem_budget // per_lane_bytes) // _LANES * _LANES)

    hw_r = -(-hw // _LANES) * _LANES
    tp_eff = max(_LANES, min(int(tp), hw_r, tp_cap))

    num_tiles = -(-hw // tp_eff)
    # Extra "parallel" split of the pixel axis: keeps both v7x TensorCores busy
    # even at batch 1-2 (harmless on single-TC v5e/v6e).
    p_split = 2 if num_tiles >= 2 else 1
    tiles_per_p = -(-num_tiles // p_split)
    has_ghost = p_split * tiles_per_p != num_tiles
    mask_needed = (hw % tp_eff != 0) or has_ghost

    if has_ghost:
        last_tile = num_tiles - 1

        def tile_map(b, p, i):
            # Ghost tiles read (and fully mask) the last valid tile.
            return (b, 0, jnp.minimum(p * tiles_per_p + i, last_tile))
    else:
        def tile_map(b, p, i):
            return (b, 0, p * tiles_per_p + i)

    kernel = functools.partial(
        _dice_sums_kernel, hw_total=hw, tp=tp_eff, tiles_per_p=tiles_per_p,
        mask_needed=mask_needed)

    inter, pcnt = pl.pallas_call(
        kernel,
        out_shape=(
            jax.ShapeDtypeStruct((n, p_split, c, _LANES), jnp.int32),  # exact counts
            jax.ShapeDtypeStruct((n, p_split, c, _LANES), jnp.int32),
        ),
        grid_spec=pltpu.PrefetchScalarGridSpec(
            num_scalar_prefetch=0,
            grid=(n, p_split, tiles_per_p),
            in_specs=[
                pl.BlockSpec((1, c, tp_eff), tile_map),
                pl.BlockSpec((1, 1, tp_eff), tile_map),
            ],
            out_specs=[
                pl.BlockSpec((1, 1, c, _LANES), lambda b, p, i: (b, p, 0, 0)),
                pl.BlockSpec((1, 1, c, _LANES), lambda b, p, i: (b, p, 0, 0)),
            ],
        ),
        compiler_params=pltpu.CompilerParams(
            dimension_semantics=("parallel", "parallel", "arbitrary"),
            vmem_limit_bytes=32 * 1024 * 1024,
        ),
    )(logits, labels)

    # Tiny epilogue in plain JAX: fold accumulators, add the truth histogram
    # (computed straight from the raw labels), divide, mean over classes.
    inter = jnp.sum(inter, axis=(0, 1, 3))                            # (C,) int32
    pred_cnt = jnp.sum(pcnt, axis=(0, 1, 3))                          # (C,) int32
    truth_cnt = jnp.sum(
        labels.reshape(-1, 1) == jnp.arange(c, dtype=jnp.int32)[None, :],
        axis=0, dtype=jnp.int32)                                      # (C,) int32
    card = pred_cnt + truth_cnt          # one-hots are 0/1, so x**2 == x
    if skip_first_class:
        inter = inter[1:]
        card = card[1:]
    dice = 2.0 * inter.astype(jnp.float32) / (card.astype(jnp.float32) + smooth)
    return dice.mean()


def _dice_score_ref(inputs, truth, *, n_classes, skip_first_class=True, smooth=1e-7):
    """Plain-JAX reference mirroring the PyTorch module (soft=False, softmax on)."""
    probs = jax.nn.softmax(inputs.astype(jnp.float32), axis=1)
    pred = jnp.argmax(probs, axis=1)                                   # (N, H, W)
    pred_oh = jnp.transpose(jax.nn.one_hot(pred, n_classes), (0, 3, 1, 2))
    truth_oh = jnp.transpose(jax.nn.one_hot(truth, n_classes), (0, 3, 1, 2))
    if skip_first_class:
        pred_oh = pred_oh[:, 1:]
        truth_oh = truth_oh[:, 1:]
    inter = jnp.sum(pred_oh * truth_oh, axis=(0, 2, 3))
    card = jnp.sum(pred_oh ** 2 + truth_oh ** 2, axis=(0, 2, 3))
    return (2.0 * inter / (card + smooth)).mean()


if __name__ == "__main__":
    key = jax.random.PRNGKey(0)
    k1, k2, k3 = jax.random.split(key, 3)

    # Primary small case (module layout): N=2, C=4, H=W=16.
    n_classes = 4
    N, C, H, W = 2, n_classes, 16, 16
    inputs = jax.random.normal(k1, (N, C, H, W), dtype=jnp.float32)
    truth = jax.random.randint(k2, (N, H, W), 0, n_classes, dtype=jnp.int32)

    out = jax.block_until_ready(dice_score(inputs, truth, n_classes=n_classes))
    ref = _dice_score_ref(inputs, truth, n_classes=n_classes)
    assert jnp.allclose(out, ref, atol=1e-5, rtol=1e-5), (out, ref)

    # bf16 logits path (native bf16 compares in-kernel, no f32 upcast).
    out_bf16 = jax.block_until_ready(
        dice_score(inputs.astype(jnp.bfloat16), truth, n_classes=n_classes))
    ref_bf16 = _dice_score_ref(inputs.astype(jnp.bfloat16), truth,
                               n_classes=n_classes)
    assert jnp.allclose(out_bf16, ref_bf16, atol=1e-5, rtol=1e-5), (out_bf16, ref_bf16)

    # Multi-tile case exercising the pixel-axis parallel split, the odd-tile
    # ghost clamp and the partial-tile mask (hw = 144*144 = 20736 -> 3 tiles).
    n_classes2 = 3
    inputs2 = jax.random.normal(k3, (1, n_classes2, 144, 144), dtype=jnp.float32)
    truth2 = jax.random.randint(k2, (1, 144, 144), 0, n_classes2, dtype=jnp.int32)
    out2 = jax.block_until_ready(dice_score(inputs2, truth2, n_classes=n_classes2))
    ref2 = _dice_score_ref(inputs2, truth2, n_classes=n_classes2)
    assert jnp.allclose(out2, ref2, atol=1e-5, rtol=1e-5), (out2, ref2)

    print("KERNEL_OK")
</pallas_src>

<mosaic_0001>
module attributes {stable_mosaic.version = 11 : i64} {
  func.func @_dice_sums_kernel(%arg0: i32, %arg1: i32, %arg2: i32, %arg3: memref<1x4x256xf32, #tpu.memory_space<vmem>>, %arg4: memref<1x1x256xi32, #tpu.memory_space<vmem>>, %arg5: memref<1x1x4x128xi32, #tpu.memory_space<vmem>>, %arg6: memref<1x1x4x128xi32, #tpu.memory_space<vmem>>) attributes {dimension_semantics = [#tpu.dimension_semantics<parallel>, #tpu.dimension_semantics<parallel>, #tpu.dimension_semantics<arbitrary>], iteration_bounds = array<i64: 2, 1, 1>, scalar_prefetch = 0 : i64, scratch_operands = 0 : i64, tpu.core_type = #tpu.core_type<tc>, window_params = [{transform_indices = @transform_0, window_bounds = array<i64: 1, 4, 256>}, {transform_indices = @transform_1, window_bounds = array<i64: 1, 1, 256>}, {transform_indices = @transform_2, window_bounds = array<i64: 1, 1, 4, 128>}, {transform_indices = @transform_3, window_bounds = array<i64: 1, 1, 4, 128>}]} {
    %c0_i32 = arith.constant 0 : i32
    %0 = arith.cmpi eq, %arg2, %c0_i32 : i32
    %1 = arith.extui %0 : i1 to i32
    %c0_i32_0 = arith.constant 0 : i32
    %2 = arith.cmpi ne, %1, %c0_i32_0 : i32
    scf.if %2 {
      %c0_i32_23 = arith.constant 0 : i32
      %41 = vector.broadcast %c0_i32_23 : i32 to vector<1x1x4x128xi32>
      %c0_24 = arith.constant 0 : index
      %c0_25 = arith.constant 0 : index
      %c0_26 = arith.constant 0 : index
      %c0_27 = arith.constant 0 : index
      %42 = vector.load %arg5[%c0_24, %c0_25, %c0_26, %c0_27] : memref<1x1x4x128xi32, #tpu.memory_space<vmem>>, vector<1x1x4x128xi32>
      tpu.vector_store %arg5[%c0_24, %c0_25, %c0_26, %c0_27], %41 {strides = array<i32>} : memref<1x1x4x128xi32, #tpu.memory_space<vmem>>, vector<1x1x4x128xi32>,
      %c0_i32_28 = arith.constant 0 : i32
      %43 = vector.broadcast %c0_i32_28 : i32 to vector<1x1x4x128xi32>
      %c0_29 = arith.constant 0 : index
      %c0_30 = arith.constant 0 : index
      %c0_31 = arith.constant 0 : index
      %c0_32 = arith.constant 0 : index
      %44 = vector.load %arg6[%c0_29, %c0_30, %c0_31, %c0_32] : memref<1x1x4x128xi32, #tpu.memory_space<vmem>>, vector<1x1x4x128xi32>
      tpu.vector_store %arg6[%c0_29, %c0_30, %c0_31, %c0_32], %43 {strides = array<i32>} : memref<1x1x4x128xi32, #tpu.memory_space<vmem>>, vector<1x1x4x128xi32>,
    } else {
    }
    %c0 = arith.constant 0 : index
    %c0_1 = arith.constant 0 : index
    %c0_2 = arith.constant 0 : index
    %3 = vector.load %arg3[%c0, %c0_1, %c0_2] : memref<1x4x256xf32, #tpu.memory_space<vmem>>, vector<1x4x256xf32>
    %4 = vector.shape_cast %3 : vector<1x4x256xf32> to vector<4x256xf32>
    %c0_3 = arith.constant 0 : index
    %c0_4 = arith.constant 0 : index
    %c0_5 = arith.constant 0 : index
    %5 = vector.load %arg4[%c0_3, %c0_4, %c0_5] : memref<1x1x256xi32, #tpu.memory_space<vmem>>, vector<1x1x256xi32>
    %6 = vector.shape_cast %5 : vector<1x1x256xi32> to vector<1x256xi32>
    %7 = tpu.iota {dimensions = array<i32: 0>} : vector<4x256xi32>
    %cst = arith.constant dense<0xFF800000> : vector<256xf32>
    %8 = vector.multi_reduction <maximumf>, %4, %cst [0] : vector<4x256xf32> to vector<256xf32>
    %9 = vector.shape_cast %8 : vector<256xf32> to vector<1x256xf32>
    %10 = vector.broadcast %9 : vector<1x256xf32> to vector<4x256xf32>
    %11 = arith.cmpf oeq, %4, %10 : vector<4x256xf32>
    %c4_i32 = arith.constant 4 : i32
    %12 = vector.broadcast %c4_i32 : i32 to vector<4x256xi32>
    %13 = arith.select %11, %7, %12 : vector<4x256xi1>, vector<4x256xi32>
    %cst_6 = arith.constant dense<2147483647> : vector<256xi32>
    %14 = vector.multi_reduction <minsi>, %13, %cst_6 [0] : vector<4x256xi32> to vector<256xi32>
    %15 = vector.shape_cast %14 : vector<256xi32> to vector<1x256xi32>
    %16 = vector.broadcast %15 : vector<1x256xi32> to vector<4x256xi32>
    %17 = arith.cmpi eq, %7, %16 : vector<4x256xi32>
    %18 = arith.cmpi eq, %15, %6 : vector<1x256xi32>
    %19 = vector.broadcast %18 : vector<1x256xi1> to vector<4x256xi1>
    %20 = arith.andi %17, %19 : vector<4x256xi1>
    %21 = arith.extui %20 : vector<4x256xi1> to vector<4x256xi32>
    %22 = vector.extract_strided_slice %21 {offsets = [0, 0], sizes = [4, 128], strides = [1, 1]} : vector<4x256xi32> to vector<4x128xi32>
    %23 = vector.extract_strided_slice %21 {offsets = [0, 128], sizes = [4, 128], strides = [1, 1]} : vector<4x256xi32> to vector<4x128xi32>
    %24 = arith.addi %22, %23 : vector<4x128xi32>
    %25 = arith.extui %17 : vector<4x256xi1> to vector<4x256xi32>
    %26 = vector.extract_strided_slice %25 {offsets = [0, 0], sizes = [4, 128], strides = [1, 1]} : vector<4x256xi32> to vector<4x128xi32>
    %27 = vector.extract_strided_slice %25 {offsets = [0, 128], sizes = [4, 128], strides = [1, 1]} : vector<4x256xi32> to vector<4x128xi32>
    %28 = arith.addi %26, %27 : vector<4x128xi32>
    %c0_7 = arith.constant 0 : index
    %c0_8 = arith.constant 0 : index
    %c0_9 = arith.constant 0 : index
    %c0_10 = arith.constant 0 : index
    %29 = vector.load %arg5[%c0_7, %c0_8, %c0_9, %c0_10] : memref<1x1x4x128xi32, #tpu.memory_space<vmem>>, vector<1x1x4x128xi32>
    %30 = vector.shape_cast %29 : vector<1x1x4x128xi32> to vector<4x128xi32>
    %31 = arith.addi %30, %24 : vector<4x128xi32>
    %c0_11 = arith.constant 0 : index
    %c0_12 = arith.constant 0 : index
    %c0_13 = arith.constant 0 : index
    %c0_14 = arith.constant 0 : index
    %32 = vector.load %arg5[%c0_11, %c0_12, %c0_13, %c0_14] : memref<1x1x4x128xi32, #tpu.memory_space<vmem>>, vector<1x1x4x128xi32>
    %33 = vector.shape_cast %32 : vector<1x1x4x128xi32> to vector<4x128xi32>
    %34 = vector.shape_cast %31 : vector<4x128xi32> to vector<1x1x4x128xi32>
    tpu.vector_store %arg5[%c0_11, %c0_12, %c0_13, %c0_14], %34 {strides = array<i32>} : memref<1x1x4x128xi32, #tpu.memory_space<vmem>>, vector<1x1x4x128xi32>,
    %c0_15 = arith.constant 0 : index
    %c0_16 = arith.constant 0 : index
    %c0_17 = arith.constant 0 : index
    %c0_18 = arith.constant 0 : index
    %35 = vector.load %arg6[%c0_15, %c0_16, %c0_17, %c0_18] : memref<1x1x4x128xi32, #tpu.memory_space<vmem>>, vector<1x1x4x128xi32>
    %36 = vector.shape_cast %35 : vector<1x1x4x128xi32> to vector<4x128xi32>
    %37 = arith.addi %36, %28 : vector<4x128xi32>
    %c0_19 = arith.constant 0 : index
    %c0_20 = arith.constant 0 : index
    %c0_21 = arith.constant 0 : index
    %c0_22 = arith.constant 0 : index
    %38 = vector.load %arg6[%c0_19, %c0_20, %c0_21, %c0_22] : memref<1x1x4x128xi32, #tpu.memory_space<vmem>>, vector<1x1x4x128xi32>
    %39 = vector.shape_cast %38 : vector<1x1x4x128xi32> to vector<4x128xi32>
    %40 = vector.shape_cast %37 : vector<4x128xi32> to vector<1x1x4x128xi32>
    tpu.vector_store %arg6[%c0_19, %c0_20, %c0_21, %c0_22], %40 {strides = array<i32>} : memref<1x1x4x128xi32, #tpu.memory_space<vmem>>, vector<1x1x4x128xi32>,
    return
  }
  func.func @transform_0(%arg0: i32, %arg1: i32, %arg2: i32) -> (i32, i32, i32) {
    %c1_i32 = arith.constant 1 : i32
    %0 = arith.muli %arg1, %c1_i32 : i32
    %1 = arith.addi %0, %arg2 : i32
    %c0_i32 = arith.constant 0 : i32
    %c0_i32_0 = arith.constant 0 : i32
    return %arg0, %c0_i32, %1 : i32, i32, i32
  }
  func.func @transform_1(%arg0: i32, %arg1: i32, %arg2: i32) -> (i32, i32, i32) {
    %c1_i32 = arith.constant 1 : i32
    %0 = arith.muli %arg1, %c1_i32 : i32
    %1 = arith.addi %0, %arg2 : i32
    %c0_i32 = arith.constant 0 : i32
    %c0_i32_0 = arith.constant 0 : i32
    return %arg0, %c0_i32, %1 : i32, i32, i32
  }
  func.func @transform_2(%arg0: i32, %arg1: i32, %arg2: i32) -> (i32, i32, i32, i32) {
    %c0_i32 = arith.constant 0 : i32
    %c0_i32_0 = arith.constant 0 : i32
    %c0_i32_1 = arith.constant 0 : i32
    return %arg0, %arg1, %c0_i32, %c0_i32_0 : i32, i32, i32, i32
  }
  func.func @transform_3(%arg0: i32, %arg1: i32, %arg2: i32) -> (i32, i32, i32, i32) {
    %c0_i32 = arith.constant 0 : i32
    %c0_i32_0 = arith.constant 0 : i32
    %c0_i32_1 = arith.constant 0 : i32
    return %arg0, %arg1, %c0_i32, %c0_i32_0 : i32, i32, i32, i32
  }
}

</mosaic_0001>

<bundles_post_ra>
// kernel: eq.8
= control target key start
LH: loop header
LB: loop body
LE: loop exit
PB: predicated region body
PF: predicated region fallthrough
CT: control target
= control target key end

     0   :  { %s69_s8 = smov 112   ;;  %s70_s11 = smov 80   ;;  %vm3_vm0 = vcmask 130048   ;;  %vm9_vm1 = vcmask 1048448   ;;  %vm15_vm2 = vcmask 917248   ;;  %vm21_vm3 = vcmask 786048   ;;  %s113_s0 = inlined_call_operand.vmem [shape: s32[2,16,16], index: 0, kind: input, shape index: {}]   ;;  %s114_s1 = inlined_call_operand.vmem [shape: s32[512], index: 1, kind: output, shape index: {}]  }
   0x1   :  { %v55_v0 = vld [vmem:[%s113_s0 + $0x7] ss:$8 sm:$0xf]   ;;  %v57_v1 = vld [vmem:[%s113_s0 + $0x5] ss:$8 sm:$0xf]  }
   0x2   :  { %7 = vrot.lane.b32.xlu0 %v55_v0, %s69_s8  ;;  %19 = vrot.lane.b32.xlu1 %v57_v1, %s70_s11  ;;  %v56_v2 = vld [vmem:[%s113_s0 + $0x6] ss:$8 sm:$0xf]   ;;  %v58_v3 = vld [vmem:[%s113_s0 + $0x4] ss:$8 sm:$0xf]  }
   0x3   :  { %s71_s16 = smov 96   ;;  %v2_v4 = vld [vmem:[%s113_s0] ss:$8 sm:$0xf]   ;;  %s72_s19 = smov 64   ;;  %vm27_vm4 = vcmask 654848  }
   0x4   :  { %v59_v5 = vld [vmem:[%s113_s0 + $0x3] ss:$8 sm:$0xf]   ;;  %4 = vst.msk [vmem:[#allocation0] sm:$0xf] %vm3_vm0, %v2_v4   ;;  %s73_s24 = smov 48  }
   0x5   :  { %v60_v6 = vld [vmem:[%s113_s0 + $0x2] ss:$8 sm:$0xf]   ;;  %s74_s25 = smov 32   ;;  %vm33_vm5 = vcmask 523648   ;;  %vm39_vm6 = vcmask 392448  }
   0x6   :  { %13 = vrot.lane.b32.xlu0 %v56_v2, %s71_s16  ;;  %25 = vrot.lane.b32.xlu1 %v58_v3, %s72_s19  ;;  %v61_v7 = vld [vmem:[%s113_s0 + $0x1] ss:$8 sm:$0xf]   ;;  %s75_s0 = smov 16   ;;  %vm45_vm7 = vcmask 261248  }
   0xa   :  { %31 = vrot.lane.b32.xlu0 %v59_v5, %s73_s24  ;;  %37 = vrot.lane.b32.xlu1 %v60_v6, %s74_s25 }
   0xe   :  { %43 = vrot.lane.b32.xlu0 %v61_v7, %s75_s0 }
  0x74   :  { %v8_v8 = vpop.permute.xlu0 %7   ;;  %v20_v9 = vpop.permute.xlu1 %19  }
  0x75   :  { %10 = vst.msk [vmem:[#allocation0] sm:$0xf] %vm9_vm1, %v8_v8  }
  0x78   :  { %v14_v10 = vpop.permute.xlu0 %13   ;;  %v26_v11 = vpop.permute.xlu1 %25  }
  0x79   :  { %16 = vst.msk [vmem:[#allocation0] sm:$0xf] %vm15_vm2, %v14_v10  }
  0x7a   :  { %22 = vst.msk [vmem:[#allocation0] sm:$0xf] %vm21_vm3, %v20_v9  }
  0x7b   :  { %28 = vst.msk [vmem:[#allocation0] sm:$0xf] %vm27_vm4, %v26_v11  }
  0x7c   :  { %v32_v12 = vpop.permute.xlu0 %31   ;;  %v38_v13 = vpop.permute.xlu1 %37  }
  0x7d   :  { %34 = vst.msk [vmem:[#allocation0] sm:$0xf] %vm33_vm5, %v32_v12  }
  0x7e   :  { %40 = vst.msk [vmem:[#allocation0] sm:$0xf] %vm39_vm6, %v38_v13  }
  0x80   :  { %v44_v14 = vpop.permute.xlu0 %43  }
  0x81   :  { %46 = vst.msk [vmem:[#allocation0] sm:$0xf] %vm45_vm7, %v44_v14  }
  0x88   :  { %v51_v15 = vld [vmem:[#allocation0] sm:$0xf] }
  0x89   :  { %54 = vst [vmem:[%s114_s1] sm:$0xf] %v51_v15 }

// kernel: dice_score.1
= control target key start
LH: loop header
LB: loop body
LE: loop exit
PB: predicated region body
PF: predicated region fallthrough
CT: control target
= control target key end

     0   :  { %s600_s12 = smov 0   ;;  %s602_s13 = smov 0   ;;  %s666_s0 = inlined_call_operand.vmem [shape: f32[2,4,256], index: 0, kind: input, shape index: {}]   ;;  %s667_s1 = inlined_call_operand.vmem [shape: s32[2,1,256], index: 1, kind: input, shape index: {}]   ;;  %s668_s2 = inlined_call_operand.vmem [shape: s32[2,1,4,128], index: 2, kind: output, shape index: {0}]   ;;  %s669_s3 = inlined_call_operand.vmem [shape: s32[2,1,4,128], index: 3, kind: output, shape index: {1}]  }
   0x1   :  { %s604_s14 = smov 0  }
   0x2 LB: > { %s33_s15 = sadd.s32 1, %s572_s13  ;;  %p518_p0 = scmp.ge.s32.totalorder %s576_s14, 1  ;;  %s576_s14 = sphi %s604_s14, %s14_s14   ;;  %s572_s13 = sphi %s602_s13, %s671_s13   ;;  %s568_s12 = sphi %s600_s12, %s670_s12  }
   0x3   : > { %p35_p1 = scmp.ge.s32.totalorder %s33_s15, 2  ;;  %p194_p2 = scmp.lt.s32.totalorder %s576_s14, 3 }
   0x5   : > { %s673_s15 = smov (%p35_p1, %s33_s15), 0  ;;  %p195_p3 = pnand %p518_p0, %p194_p2 }
   0x6   : > { %p243_p4 = scmp.lt.s32.totalorder (!%p195_p3), %s568_s12, 1 }
   0x7   : > { %198 = sbr.rel (%p195_p3) target bundleno = 62 (0x3e), region = 28 }
   0xc   : > { %s675_s12 = smov (!%p243_p4, %s568_s12), 1  ;;  %vm291_vm0 = vcmask 1043456   ;;  %v578_v3 = vmov 0   ;;  %v286_v5 = vlaneseq  ;;  %v579_v7 = vmov 839922192  }
   0xd   : > { %s526_s16 = sshll.u32 %s675_s12, 3  ;;  %s522_s20 = sshll.u32 %s675_s12, 2  ;;  %v312_v8 = vunpack.c.l.s4 %v579_v7 }
   0xe   : > { %s250_s19 = scalar_lea.vmem %s666_s0, %s526_s16  ;;  %s628_s23 = scalar_lea.vmem %s668_s2, %s522_s20  ;;  %v287_v13 = vshrl.u32 %v286_v5, 7 }
   0xf   : > { %v284_v0 = vld [vmem:[%s250_s19] sm:$0xff]  ;;  %s634_s26 = scalar_lea.vmem %s669_s3, %s522_s20  ;;  %282 = vst [vmem:[%s628_s23] sm:$0xf] %v578_v3  ;;  %v313_v14 = vunpack.c.0.s8 %v312_v8  ;;  %s521_s27 = sshll.u32 %s675_s12, 1 }
  0x10   : > { %v289_v1 = vcombine.high %v284_v0, %v284_v0  ;;  %v292_v2 = vsel %vm291_vm0, %v284_v0, -inf  ;;  %283 = vst [vmem:[%s634_s26] sm:$0xf] %v578_v3  ;;  %s261_s30 = scalar_lea.vmem %s667_s1, %s521_s27  ;;  %v344_v32 = vsub.s32 0, %v287_v13  ;;  %v348_v36 = vsub.s32 1, %v287_v13 }
  0x11   : > { %v293_v4 = vrot.slane %v292_v2, 4  ;;  %v316_v19 = vsub.s32 %v313_v14, %v287_v13  ;;  %v285_v34 = vld [vmem:[%s261_s30] sm:$0x3] }
  0x12   : > { %v299_v6 = vsel %vm291_vm0, %v289_v1, -inf  ;;  %v345_v39 = vrot.slane %v285_v34, %v344_v32  ;;  %v349_v42 = vrot.slane %v285_v34, %v348_v36 }
  0x13   : > { %v294_v9 = vmax.f32 %v292_v2, %v293_v4  ;;  %v300_v10 = vrot.slane %v299_v6, 4  ;;  %v317_v23 = vrot.slane %v287_v13, %v316_v19 }
  0x15   : > { %v295_v11 = vrot.slane %v294_v9, 2  ;;  %v301_v12 = vmax.f32 %v299_v6, %v300_v10 }
  0x16   : > { %v372_v57 = vld [vmem:[%s628_s23] sm:$0xf] }
  0x17   : > { %v296_v15 = vmax.f32 %v294_v9, %v295_v11  ;;  %v302_v16 = vrot.slane %v301_v12, 2  ;;  %v375_v51 = vld [vmem:[%s634_s26] sm:$0xf] }
  0x19   : > { %v297_v17 = vrot.slane %v296_v15, 1  ;;  %v303_v18 = vmax.f32 %v301_v12, %v302_v16 }
  0x1b   : > { %v298_v20 = vmax.f32 %v296_v15, %v297_v17  ;;  %v304_v21 = vrot.slane %v303_v18, 1 }
  0x1d   : > { %v305_v22 = vmax.f32 %v303_v18, %v304_v21 }
  0x1f   : > { %v308_v24 = vcombine.low %v298_v20, %v305_v22 }
  0x21   : > { %vm310_vm1 = vcmp.eq.f32.partialorder %v284_v0, %v308_v24 }
  0x22   : > { %v318_v25 = vsel %vm310_vm1, %v317_v23, 4 }
  0x23   : > { %v319_v26 = vcombine.high %v318_v25, %v318_v25  ;;  %v320_v27 = vsel %vm291_vm0, %v318_v25, 2147483647 }
  0x24   : > { %v321_v28 = vrot.slane %v320_v27, 4 }
  0x25   : > { %v330_v29 = vsel %vm291_vm0, %v319_v26, 2147483647 }
  0x26   : > { %vm322_vm2 = vcmp.lt.s32.totalorder %v320_v27, %v321_v28  ;;  %v331_v30 = vrot.slane %v330_v29, 4 }
  0x27   : > { %v323_v31 = vsel %vm322_vm2, %v320_v27, %v321_v28 }
  0x28   : > { %v324_v33 = vrot.slane %v323_v31, 2  ;;  %vm332_vm3 = vcmp.lt.s32.totalorder %v330_v29, %v331_v30 }
  0x29   : > { %v333_v35 = vsel %vm332_vm3, %v330_v29, %v331_v30 }
  0x2a   : > { %vm325_vm4 = vcmp.lt.s32.totalorder %v323_v31, %v324_v33  ;;  %v334_v37 = vrot.slane %v333_v35, 2 }
  0x2b   : > { %v326_v38 = vsel %vm325_vm4, %v323_v31, %v324_v33 }
  0x2c   : > { %v327_v40 = vrot.slane %v326_v38, 1  ;;  %vm335_vm5 = vcmp.lt.s32.totalorder %v333_v35, %v334_v37 }
  0x2d   : > { %v336_v41 = vsel %vm335_vm5, %v333_v35, %v334_v37 }
  0x2e   : > { %vm328_vm6 = vcmp.lt.s32.totalorder %v326_v38, %v327_v40  ;;  %v337_v43 = vrot.slane %v336_v41, 1 }
  0x2f   : > { %v329_v44 = vsel %vm328_vm6, %v326_v38, %v327_v40 }
  0x30   : > { %vm338_vm7 = vcmp.lt.s32.totalorder %v336_v41, %v337_v43  ;;  %vm340_vm8 = vcmp.eq.s32.totalorder %v287_v13, %v329_v44  ;;  %vm350_vm9 = vcmp.eq.s32.totalorder %v329_v44, %v345_v39 }
  0x31   : > { %v339_v45 = vsel %vm338_vm7, %v336_v41, %v337_v43  ;;  %v352_v46 = vsel %vm350_vm9, 1, %v578_v3  ;;  %v369_v47 = vsel %vm340_vm8, 1, %v578_v3 }
  0x32   : > { %vm341_vm10 = vcmp.eq.s32.totalorder %v287_v13, %v339_v45  ;;  %vm351_vm11 = vcmp.eq.s32.totalorder %v339_v45, %v349_v42  ;;  %v357_v48 = vrot.slane %v352_v46, %v344_v32 }
  0x33   : > { %v353_v49 = vsel %vm351_vm11, 1, %v578_v3  ;;  %v370_v50 = vsel %vm341_vm10, 1, %v578_v3 }
  0x34   : > { %v361_v52 = vrot.slane %v353_v49, %v344_v32  ;;  %vm362_vm12 = vcmp.eq.s32.totalorder %v357_v48, 1  ;;  %v371_v53 = vadd.s32 %v370_v50, %v369_v47 }
  0x35   : > { %vm364_vm13 = vmand %vm340_vm8, %vm362_vm12 }
  0x36   : > { %vm363_vm14 = vcmp.eq.s32.totalorder %v361_v52, 1  ;;  %v366_v54 = vsel %vm364_vm13, 1, %v578_v3  ;;  %v376_v55 = vadd.s32 %v375_v51, %v371_v53 }
  0x37   : > { %vm365_vm15 = vmand %vm341_vm10, %vm363_vm14 }
  0x38   : > { %v367_v56 = vsel %vm365_vm15, 1, %v578_v3  ;;  %377 = vst [vmem:[%s634_s26] sm:$0xf] %v376_v55 }
  0x39   : > { %v368_v58 = vadd.s32 %v367_v56, %v366_v54 }
  0x3b   : > { %v373_v59 = vadd.s32 %v372_v57, %v368_v58 }
  0x3d   : > { %374 = vst [vmem:[%s628_s23] sm:$0xf] %v373_v59 }
  0x3e PF: > { %s14_s14 = sadd.s32 1, %s576_s14   ;;  %s670_s12 = smov %s572_s13 }
  0x3f   : > { %p11_p5 = scmp.ge.s32.totalorder %s14_s14, 4   ;;  %s671_s13 = smov %s673_s15 }
  0x41   :  { %13 = sbr.rel (!%p11_p5) target bundleno = 2 (0x2), region = 77 }

</bundles_post_ra>
